<compile_context>
chip_gen: v5e
topology: v5e:2x2
jax: 0.10.0
libtpu: 0.0.40
codegen_flags: <defaults>
</compile_context>

<pallas_src>
import functools

import jax
import jax.numpy as jnp
from jax.experimental import pallas as pl
from jax.experimental.pallas import tpu as pltpu


# ----------------------------------------------------------------------------
# Fused Pallas kernel: all heads + output layer + ELU + log_softmax
# ----------------------------------------------------------------------------
def _elu(y):
    # ELU(alpha=1): exp only of the clamped value so the untaken branch never
    # produces inf / wasted transcendentals.
    return jnp.where(y > 0, y, jnp.exp(jnp.minimum(y, 0.0)) - 1.0)


def _gat_fused_kernel(x_ref, w_big_ref, wo_big_ref, adj_ref, out_ref, *,
                      n_heads, f_hid, n_class, alpha):
    x = x_ref[...]                                         # [N, F_in]
    n = x.shape[0]

    # Additive adjacency bias, computed once and reused by every head and the
    # output layer.  NOTE: self-loops in adj guarantee every row keeps at
    # least one un-masked entry, so no row degenerates to a uniform softmax.
    adj_bias = jnp.where(adj_ref[...] > 0, 0.0, -1.0e12)   # [N, N]

    def attention(h_feat, f1, f2):
        # e[i, j] = LeakyReLU(f1[i] + f2[j]) + adj_bias[i, j]
        e = f1 + f2.T                                      # [N, N]
        e = jnp.where(e > 0, e, alpha * e) + adj_bias      # LeakyReLU + mask
        # numerically-stable softmax; normalisation deferred past the matmul
        m = jnp.max(e, axis=1, keepdims=True)
        p = jnp.exp(e - m)                                 # [N, N]
        inv = 1.0 / jnp.sum(p, axis=1, keepdims=True)      # [N, 1]
        y = jnp.dot(p, h_feat, preferred_element_type=jnp.float32)
        return y * inv                                     # [N, F]

    # One MXU matmul yields all head features and the folded attention-logit
    # columns x @ (W_h @ a1_h), x @ (W_h @ a2_h).
    hz = jnp.dot(x, w_big_ref[...], preferred_element_type=jnp.float32)
    base = n_heads * f_hid

    head_outs = []
    for h in range(n_heads):                               # tiny static unroll
        h_feat = hz[:, h * f_hid:(h + 1) * f_hid]          # [N, F_hid]
        f1 = hz[:, base + h:base + h + 1]                  # [N, 1]
        f2 = hz[:, base + n_heads + h:base + n_heads + h + 1]
        head_outs.append(_elu(attention(h_feat, f1, f2)))  # concat=True heads
    h_cat = jnp.concatenate(head_outs, axis=1)             # [N, H*F_hid]

    # Output attention layer (concat=False), attention vector folded into W.
    z = jnp.dot(h_cat, wo_big_ref[...], preferred_element_type=jnp.float32)
    y = attention(z[:, :n_class],
                  z[:, n_class:n_class + 1],
                  z[:, n_class + 1:n_class + 2])           # [N, n_class]

    # GAT.forward: ELU then log_softmax(dim=1)
    y = _elu(y)
    y = y - jnp.max(y, axis=1, keepdims=True)
    y = y - jnp.log(jnp.sum(jnp.exp(y), axis=1, keepdims=True))

    # Lane-dense store: pad out to the full (128-multiple) output width so the
    # final store is an unmasked full-vreg store; wrapper slices back.
    c_pad = out_ref.shape[1]
    if c_pad > n_class:
        pad = jnp.zeros((n, c_pad - n_class), dtype=y.dtype)
        y = jnp.concatenate([y, pad], axis=1)
    out_ref[...] = y.astype(out_ref.dtype)


# ----------------------------------------------------------------------------
# Wrapper: fold attention vectors into weights, one pallas_call for the model
# ----------------------------------------------------------------------------
def gat_forward(x, adj, params, *, alpha):
    """Full GAT forward (eval mode) as one fused Pallas kernel call."""
    n, _ = x.shape
    heads = params["heads"]
    n_heads = len(heads)
    f_hid = heads[0][0].shape[1]
    w_out, a_out = params["out_W"], params["out_a"]
    n_class = w_out.shape[1]

    # Fold each head's attention vector into its weight matrix:
    #   (x @ W) @ a1 == x @ (W @ a1)  -> extra columns of one big matmul.
    w_cols = [w for (w, _) in heads]
    wa1 = [w @ a[:f_hid] for (w, a) in heads]              # [F_in, 1] each
    wa2 = [w @ a[f_hid:] for (w, a) in heads]
    w_big = jnp.concatenate(w_cols + wa1 + wa2, axis=1)    # [F_in, H*F_hid+2H]

    wo_big = jnp.concatenate(
        [w_out, w_out @ a_out[:n_class], w_out @ a_out[n_class:]], axis=1)

    c_pad = max(128, ((n_class + 127) // 128) * 128)       # lane-dense output

    kernel = functools.partial(
        _gat_fused_kernel, n_heads=n_heads, f_hid=f_hid,
        n_class=n_class, alpha=alpha)

    out_padded = pl.pallas_call(
        kernel,
        out_shape=jax.ShapeDtypeStruct((n, c_pad), jnp.float32),
        # No grid: single invocation, full arrays resident in VMEM.
        in_specs=[pl.BlockSpec(memory_space=pltpu.MemorySpace.VMEM)] * 4,
        out_specs=pl.BlockSpec(memory_space=pltpu.MemorySpace.VMEM),
    )(x, w_big, wo_big, adj)
    return out_padded[:, :n_class]


# ----------------------------------------------------------------------------
# Deterministic parameter init (xavier_uniform_ with gain=1.414)
# ----------------------------------------------------------------------------
def xavier_uniform(key, shape, gain=1.414):
    fan_in, fan_out = shape[0], shape[1]
    limit = gain * jnp.sqrt(6.0 / (fan_in + fan_out))
    return jax.random.uniform(key, shape, jnp.float32, -limit, limit)


def init_gat_params(key, n_feat, n_hid, n_class, n_heads):
    keys = jax.random.split(key, 2 * n_heads + 2)
    heads = []
    for i in range(n_heads):
        W = xavier_uniform(keys[2 * i], (n_feat, n_hid))
        a = xavier_uniform(keys[2 * i + 1], (2 * n_hid, 1))
        heads.append((W, a))
    out_W = xavier_uniform(keys[-2], (n_hid * n_heads, n_class))
    out_a = xavier_uniform(keys[-1], (2 * n_class, 1))
    return {"heads": heads, "out_W": out_W, "out_a": out_a}


# ----------------------------------------------------------------------------
# Pure-JAX reference (mirrors the PyTorch module in eval mode)
# ----------------------------------------------------------------------------
def _ref_layer(x, adj, W, a, alpha, apply_elu):
    h = x @ W
    f_out = W.shape[1]
    e = (h @ a[:f_out]) + (h @ a[f_out:]).T
    e = jnp.where(e > 0, e, alpha * e)
    e = jnp.where(adj > 0, e, -1.0e12)
    attn = jax.nn.softmax(e, axis=1)
    y = attn @ h
    return jax.nn.elu(y) if apply_elu else y


def _ref_gat(x, adj, params, alpha):
    h = jnp.concatenate(
        [_ref_layer(x, adj, W, a, alpha, True) for (W, a) in params["heads"]],
        axis=1)
    y = jax.nn.elu(_ref_layer(h, adj, params["out_W"], params["out_a"],
                              alpha, False))
    return jax.nn.log_softmax(y, axis=1)


# ----------------------------------------------------------------------------
if __name__ == "__main__":
    N, n_feat, n_hid, n_class, n_heads = 8, 16, 8, 4, 2
    alpha = 0.2
    # dropout p = 0.6 in the module, identity in eval mode

    key = jax.random.PRNGKey(0)
    k_x, k_adj, k_par = jax.random.split(key, 3)

    x = jax.random.normal(k_x, (N, n_feat), jnp.float32)
    # random sparse adjacency with self loops (so no row is fully masked)
    adj = (jax.random.uniform(k_adj, (N, N)) > 0.5).astype(jnp.float32)
    adj = jnp.maximum(adj, jnp.eye(N, dtype=jnp.float32))

    params = init_gat_params(k_par, n_feat, n_hid, n_class, n_heads)

    out = gat_forward(x, adj, params, alpha=alpha)
    out = jax.block_until_ready(out)

    ref = _ref_gat(x, adj, params, alpha)
    assert out.shape == (N, n_class)
    # f32 tolerance is slightly looser than before: folding W@a and deferring
    # the softmax normalisation reassociate the reductions.
    assert jnp.allclose(out, ref, atol=1e-3, rtol=1e-3), "mismatch vs reference"

    print("KERNEL_OK")
</pallas_src>

<mosaic_0001>
module attributes {stable_mosaic.version = 11 : i64} {
  func.func @_gat_fused_kernel(%arg0: memref<8x16xf32, #tpu.memory_space<vmem>>, %arg1: memref<16x20xf32, #tpu.memory_space<vmem>>, %arg2: memref<16x6xf32, #tpu.memory_space<vmem>>, %arg3: memref<8x8xf32, #tpu.memory_space<vmem>>, %arg4: memref<8x128xf32, #tpu.memory_space<vmem>>) attributes {dimension_semantics = [], scalar_prefetch = 0 : i64, scratch_operands = 0 : i64, tpu.core_type = #tpu.core_type<tc>} {
    %c0 = arith.constant 0 : index
    %c0_0 = arith.constant 0 : index
    %0 = vector.load %arg0[%c0, %c0_0] : memref<8x16xf32, #tpu.memory_space<vmem>>, vector<8x16xf32>
    %c0_1 = arith.constant 0 : index
    %c0_2 = arith.constant 0 : index
    %1 = vector.load %arg3[%c0_1, %c0_2] : memref<8x8xf32, #tpu.memory_space<vmem>>, vector<8x8xf32>
    %cst = arith.constant 0.000000e+00 : f32
    %2 = vector.broadcast %cst : f32 to vector<8x8xf32>
    %3 = arith.cmpf ogt, %1, %2 : vector<8x8xf32>
    %cst_3 = arith.constant 0.000000e+00 : f32
    %cst_4 = arith.constant -9.99999995E+11 : f32
    %4 = vector.broadcast %cst_3 : f32 to vector<8x8xf32>
    %5 = vector.broadcast %cst_4 : f32 to vector<8x8xf32>
    %6 = arith.select %3, %4, %5 : vector<8x8xi1>, vector<8x8xf32>
    %c0_5 = arith.constant 0 : index
    %c0_6 = arith.constant 0 : index
    %7 = vector.load %arg1[%c0_5, %c0_6] : memref<16x20xf32, #tpu.memory_space<vmem>>, vector<16x20xf32>
    %cst_7 = arith.constant dense<0.000000e+00> : vector<8x20xf32>
    %8 = tpu.matmul %0, %7, %cst_7 {dimension_numbers = #tpu.dot_dimension_numbers<[1], [0], [0], [1], [0, 0, 1, 1], [], []>} : vector<8x16xf32>, vector<16x20xf32>, vector<8x20xf32> -> vector<8x20xf32>
    %9 = vector.extract_strided_slice %8 {offsets = [0, 0], sizes = [8, 8], strides = [1, 1]} : vector<8x20xf32> to vector<8x8xf32>
    %10 = vector.extract_strided_slice %8 {offsets = [0, 16], sizes = [8, 1], strides = [1, 1]} : vector<8x20xf32> to vector<8x1xf32>
    %11 = vector.extract_strided_slice %8 {offsets = [0, 18], sizes = [8, 1], strides = [1, 1]} : vector<8x20xf32> to vector<8x1xf32>
    %12 = tpu.transpose %11, [1, 0] : vector<8x1xf32> -> vector<1x8xf32>
    %13 = vector.broadcast %10 : vector<8x1xf32> to vector<8x8xf32>
    %14 = vector.broadcast %12 : vector<1x8xf32> to vector<8x8xf32>
    %15 = arith.addf %13, %14 : vector<8x8xf32>
    %cst_8 = arith.constant 0.000000e+00 : f32
    %16 = vector.broadcast %cst_8 : f32 to vector<8x8xf32>
    %17 = arith.cmpf ogt, %15, %16 : vector<8x8xf32>
    %cst_9 = arith.constant 2.000000e-01 : f32
    %18 = vector.broadcast %cst_9 : f32 to vector<8x8xf32>
    %19 = arith.mulf %18, %15 : vector<8x8xf32>
    %20 = arith.select %17, %15, %19 : vector<8x8xi1>, vector<8x8xf32>
    %21 = arith.addf %20, %6 : vector<8x8xf32>
    %cst_10 = arith.constant dense<0xFF800000> : vector<8xf32>
    %22 = vector.multi_reduction <maximumf>, %21, %cst_10 [1] : vector<8x8xf32> to vector<8xf32>
    %23 = vector.shape_cast %22 : vector<8xf32> to vector<8x1xf32>
    %24 = vector.broadcast %23 : vector<8x1xf32> to vector<8x8xf32>
    %25 = arith.subf %21, %24 : vector<8x8xf32>
    %26 = math.exp %25 : vector<8x8xf32>
    %cst_11 = arith.constant dense<0.000000e+00> : vector<8xf32>
    %27 = vector.multi_reduction <add>, %26, %cst_11 [1] : vector<8x8xf32> to vector<8xf32>
    %28 = vector.shape_cast %27 : vector<8xf32> to vector<8x1xf32>
    %cst_12 = arith.constant 1.000000e+00 : f32
    %29 = vector.broadcast %cst_12 : f32 to vector<8x1xf32>
    %30 = arith.divf %29, %28 : vector<8x1xf32>
    %cst_13 = arith.constant dense<0.000000e+00> : vector<8x8xf32>
    %31 = tpu.matmul %26, %9, %cst_13 {dimension_numbers = #tpu.dot_dimension_numbers<[1], [0], [0], [1], [0, 0, 1, 1], [], []>} : vector<8x8xf32>, vector<8x8xf32>, vector<8x8xf32> -> vector<8x8xf32>
    %32 = vector.broadcast %30 : vector<8x1xf32> to vector<8x8xf32>
    %33 = arith.mulf %31, %32 : vector<8x8xf32>
    %cst_14 = arith.constant 0.000000e+00 : f32
    %34 = vector.broadcast %cst_14 : f32 to vector<8x8xf32>
    %35 = arith.cmpf ogt, %33, %34 : vector<8x8xf32>
    %cst_15 = arith.constant 0.000000e+00 : f32
    %36 = vector.broadcast %cst_15 : f32 to vector<8x8xf32>
    %37 = arith.minimumf %33, %36 : vector<8x8xf32>
    %38 = math.exp %37 : vector<8x8xf32>
    %cst_16 = arith.constant 1.000000e+00 : f32
    %39 = vector.broadcast %cst_16 : f32 to vector<8x8xf32>
    %40 = arith.subf %38, %39 : vector<8x8xf32>
    %41 = arith.select %35, %33, %40 : vector<8x8xi1>, vector<8x8xf32>
    %42 = vector.extract_strided_slice %8 {offsets = [0, 8], sizes = [8, 8], strides = [1, 1]} : vector<8x20xf32> to vector<8x8xf32>
    %43 = vector.extract_strided_slice %8 {offsets = [0, 17], sizes = [8, 1], strides = [1, 1]} : vector<8x20xf32> to vector<8x1xf32>
    %44 = vector.extract_strided_slice %8 {offsets = [0, 19], sizes = [8, 1], strides = [1, 1]} : vector<8x20xf32> to vector<8x1xf32>
    %45 = tpu.transpose %44, [1, 0] : vector<8x1xf32> -> vector<1x8xf32>
    %46 = vector.broadcast %43 : vector<8x1xf32> to vector<8x8xf32>
    %47 = vector.broadcast %45 : vector<1x8xf32> to vector<8x8xf32>
    %48 = arith.addf %46, %47 : vector<8x8xf32>
    %cst_17 = arith.constant 0.000000e+00 : f32
    %49 = vector.broadcast %cst_17 : f32 to vector<8x8xf32>
    %50 = arith.cmpf ogt, %48, %49 : vector<8x8xf32>
    %cst_18 = arith.constant 2.000000e-01 : f32
    %51 = vector.broadcast %cst_18 : f32 to vector<8x8xf32>
    %52 = arith.mulf %51, %48 : vector<8x8xf32>
    %53 = arith.select %50, %48, %52 : vector<8x8xi1>, vector<8x8xf32>
    %54 = arith.addf %53, %6 : vector<8x8xf32>
    %cst_19 = arith.constant dense<0xFF800000> : vector<8xf32>
    %55 = vector.multi_reduction <maximumf>, %54, %cst_19 [1] : vector<8x8xf32> to vector<8xf32>
    %56 = vector.shape_cast %55 : vector<8xf32> to vector<8x1xf32>
    %57 = vector.broadcast %56 : vector<8x1xf32> to vector<8x8xf32>
    %58 = arith.subf %54, %57 : vector<8x8xf32>
    %59 = math.exp %58 : vector<8x8xf32>
    %cst_20 = arith.constant dense<0.000000e+00> : vector<8xf32>
    %60 = vector.multi_reduction <add>, %59, %cst_20 [1] : vector<8x8xf32> to vector<8xf32>
    %61 = vector.shape_cast %60 : vector<8xf32> to vector<8x1xf32>
    %cst_21 = arith.constant 1.000000e+00 : f32
    %62 = vector.broadcast %cst_21 : f32 to vector<8x1xf32>
    %63 = arith.divf %62, %61 : vector<8x1xf32>
    %cst_22 = arith.constant dense<0.000000e+00> : vector<8x8xf32>
    %64 = tpu.matmul %59, %42, %cst_22 {dimension_numbers = #tpu.dot_dimension_numbers<[1], [0], [0], [1], [0, 0, 1, 1], [], []>} : vector<8x8xf32>, vector<8x8xf32>, vector<8x8xf32> -> vector<8x8xf32>
    %65 = vector.broadcast %63 : vector<8x1xf32> to vector<8x8xf32>
    %66 = arith.mulf %64, %65 : vector<8x8xf32>
    %cst_23 = arith.constant 0.000000e+00 : f32
    %67 = vector.broadcast %cst_23 : f32 to vector<8x8xf32>
    %68 = arith.cmpf ogt, %66, %67 : vector<8x8xf32>
    %cst_24 = arith.constant 0.000000e+00 : f32
    %69 = vector.broadcast %cst_24 : f32 to vector<8x8xf32>
    %70 = arith.minimumf %66, %69 : vector<8x8xf32>
    %71 = math.exp %70 : vector<8x8xf32>
    %cst_25 = arith.constant 1.000000e+00 : f32
    %72 = vector.broadcast %cst_25 : f32 to vector<8x8xf32>
    %73 = arith.subf %71, %72 : vector<8x8xf32>
    %74 = arith.select %68, %66, %73 : vector<8x8xi1>, vector<8x8xf32>
    %75 = tpu.concatenate %41, %74 in 1 : vector<8x8xf32>, vector<8x8xf32> -> vector<8x16xf32>
    %c0_26 = arith.constant 0 : index
    %c0_27 = arith.constant 0 : index
    %76 = vector.load %arg2[%c0_26, %c0_27] : memref<16x6xf32, #tpu.memory_space<vmem>>, vector<16x6xf32>
    %cst_28 = arith.constant dense<0.000000e+00> : vector<8x6xf32>
    %77 = tpu.matmul %75, %76, %cst_28 {dimension_numbers = #tpu.dot_dimension_numbers<[1], [0], [0], [1], [0, 0, 1, 1], [], []>} : vector<8x16xf32>, vector<16x6xf32>, vector<8x6xf32> -> vector<8x6xf32>
    %78 = vector.extract_strided_slice %77 {offsets = [0, 0], sizes = [8, 4], strides = [1, 1]} : vector<8x6xf32> to vector<8x4xf32>
    %79 = vector.extract_strided_slice %77 {offsets = [0, 4], sizes = [8, 1], strides = [1, 1]} : vector<8x6xf32> to vector<8x1xf32>
    %80 = vector.extract_strided_slice %77 {offsets = [0, 5], sizes = [8, 1], strides = [1, 1]} : vector<8x6xf32> to vector<8x1xf32>
    %81 = tpu.transpose %80, [1, 0] : vector<8x1xf32> -> vector<1x8xf32>
    %82 = vector.broadcast %79 : vector<8x1xf32> to vector<8x8xf32>
    %83 = vector.broadcast %81 : vector<1x8xf32> to vector<8x8xf32>
    %84 = arith.addf %82, %83 : vector<8x8xf32>
    %cst_29 = arith.constant 0.000000e+00 : f32
    %85 = vector.broadcast %cst_29 : f32 to vector<8x8xf32>
    %86 = arith.cmpf ogt, %84, %85 : vector<8x8xf32>
    %cst_30 = arith.constant 2.000000e-01 : f32
    %87 = vector.broadcast %cst_30 : f32 to vector<8x8xf32>
    %88 = arith.mulf %87, %84 : vector<8x8xf32>
    %89 = arith.select %86, %84, %88 : vector<8x8xi1>, vector<8x8xf32>
    %90 = arith.addf %89, %6 : vector<8x8xf32>
    %cst_31 = arith.constant dense<0xFF800000> : vector<8xf32>
    %91 = vector.multi_reduction <maximumf>, %90, %cst_31 [1] : vector<8x8xf32> to vector<8xf32>
    %92 = vector.shape_cast %91 : vector<8xf32> to vector<8x1xf32>
    %93 = vector.broadcast %92 : vector<8x1xf32> to vector<8x8xf32>
    %94 = arith.subf %90, %93 : vector<8x8xf32>
    %95 = math.exp %94 : vector<8x8xf32>
    %cst_32 = arith.constant dense<0.000000e+00> : vector<8xf32>
    %96 = vector.multi_reduction <add>, %95, %cst_32 [1] : vector<8x8xf32> to vector<8xf32>
    %97 = vector.shape_cast %96 : vector<8xf32> to vector<8x1xf32>
    %cst_33 = arith.constant 1.000000e+00 : f32
    %98 = vector.broadcast %cst_33 : f32 to vector<8x1xf32>
    %99 = arith.divf %98, %97 : vector<8x1xf32>
    %cst_34 = arith.constant dense<0.000000e+00> : vector<8x4xf32>
    %100 = tpu.matmul %95, %78, %cst_34 {dimension_numbers = #tpu.dot_dimension_numbers<[1], [0], [0], [1], [0, 0, 1, 1], [], []>} : vector<8x8xf32>, vector<8x4xf32>, vector<8x4xf32> -> vector<8x4xf32>
    %101 = vector.broadcast %99 : vector<8x1xf32> to vector<8x4xf32>
    %102 = arith.mulf %100, %101 : vector<8x4xf32>
    %cst_35 = arith.constant 0.000000e+00 : f32
    %103 = vector.broadcast %cst_35 : f32 to vector<8x4xf32>
    %104 = arith.cmpf ogt, %102, %103 : vector<8x4xf32>
    %cst_36 = arith.constant 0.000000e+00 : f32
    %105 = vector.broadcast %cst_36 : f32 to vector<8x4xf32>
    %106 = arith.minimumf %102, %105 : vector<8x4xf32>
    %107 = math.exp %106 : vector<8x4xf32>
    %cst_37 = arith.constant 1.000000e+00 : f32
    %108 = vector.broadcast %cst_37 : f32 to vector<8x4xf32>
    %109 = arith.subf %107, %108 : vector<8x4xf32>
    %110 = arith.select %104, %102, %109 : vector<8x4xi1>, vector<8x4xf32>
    %cst_38 = arith.constant dense<0xFF800000> : vector<8xf32>
    %111 = vector.multi_reduction <maximumf>, %110, %cst_38 [1] : vector<8x4xf32> to vector<8xf32>
    %112 = vector.shape_cast %111 : vector<8xf32> to vector<8x1xf32>
    %113 = vector.broadcast %112 : vector<8x1xf32> to vector<8x4xf32>
    %114 = arith.subf %110, %113 : vector<8x4xf32>
    %115 = math.exp %114 : vector<8x4xf32>
    %cst_39 = arith.constant dense<0.000000e+00> : vector<8xf32>
    %116 = vector.multi_reduction <add>, %115, %cst_39 [1] : vector<8x4xf32> to vector<8xf32>
    %117 = vector.shape_cast %116 : vector<8xf32> to vector<8x1xf32>
    %118 = math.log %117 : vector<8x1xf32>
    %119 = vector.broadcast %118 : vector<8x1xf32> to vector<8x4xf32>
    %120 = arith.subf %114, %119 : vector<8x4xf32>
    %cst_40 = arith.constant 0.000000e+00 : f32
    %121 = vector.broadcast %cst_40 : f32 to vector<8x124xf32>
    %122 = tpu.concatenate %120, %121 in 1 : vector<8x4xf32>, vector<8x124xf32> -> vector<8x128xf32>
    %c0_41 = arith.constant 0 : index
    %c0_42 = arith.constant 0 : index
    %123 = vector.load %arg4[%c0_41, %c0_42] : memref<8x128xf32, #tpu.memory_space<vmem>>, vector<8x128xf32>
    tpu.vector_store %arg4[%c0_41, %c0_42], %122 {strides = array<i32>} : memref<8x128xf32, #tpu.memory_space<vmem>>, vector<8x128xf32>,
    return
  }
}

</mosaic_0001>

<bundles_post_ra>
// kernel: tpu_custom_call.1
= control target key start
LH: loop header
LB: loop body
LE: loop exit
PB: predicated region body
PF: predicated region fallthrough
CT: control target
= control target key end

     0   :  { %9 = vsyncpa [#allocation3], 0  ;;  %s602_s0 = inlined_call_operand.vmem [shape: f32[8,16], index: 0, kind: input, shape index: {}]   ;;  %s603_s1 = inlined_call_operand.vmem [shape: f32[16,20], index: 1, kind: input, shape index: {}]   ;;  %s604_s2 = inlined_call_operand.vmem [shape: f32[16,6], index: 2, kind: input, shape index: {}]   ;;  %s605_s3 = inlined_call_operand.hbm [shape: f32[8,8], index: 3, kind: input, shape index: {}]   ;;  %s606_s4 = inlined_call_operand.hbm [shape: f32[8,128], index: 4, kind: output, shape index: {}]  }
   0x1   :  { %10 = vsyncpa [#allocation4], 0  ;;  %s22_s17 = sshll.u32 %s605_s3, 4  ;;  %s525_s18 = smov [#allocation2]   ;;  %s23_s17 = int_to_ptr.hbm [resolvable:$true] %s22_s17 }
   0x2   :  { %s24_s19 = sshll.u32 %s525_s18, 4  ;;  %s25_s19 = int_to_ptr.vmem [resolvable:$true] %s24_s19 }
   0x3   :  { %27 = dma.hbm_to_vmem [thread:$0]  %s23_s17, 128, %s25_s19, [#allocation3]  }
   0x4   :  { %521 = dma.done.wait [#allocation3], 128  }
   0x5   :  { %522 = vsyncadd [#allocation3], 4294967168  ;;  %v526_v0 = vmov 16   ;;  %v37_v1 = vld [vmem:[%s603_s1 + $0x8] sm:$0xff]  ;;  %v36_v2 = vld [vmem:[%s603_s1] sm:$0xff]  ;;  %vm38_vm0 = vcmask 130048  }
   0x6   :  { %448 = vset.pattern.permute.xlu2 %v526_v0  ;;  %56 = vmatpush.msra.mxu0 %v37_v1  ;;  %v32_v3 = vld [vmem:[%s602_s0] sm:$0xff]  ;;  %v527_v4 = vmov 17   ;;  %s528_s25 = smov 109   ;;  %s529_s26 = smov 120   ;;  %v531_v14 = vmov -1e+12  }
   0x7   :  { %447 = vset.pattern.permute.xlu0 %v527_v4  ;;  %s530_s0 = smov 110   ;;  %v33_v9 = vld [vmem:[#allocation2] sm:$0xff]  ;;  %vm108_vm3 = vcmask 64512   ;;  %s532_s1 = smov 8   ;;  %v271_v56 = vld [vmem:[%s604_s2 + $0x8] sm:$0xff] }
   0x8   :  { %57 = vmatpush.msra.mxu0 %v36_v2  ;;  %vm34_vm1 = vcmp.gt.f32.partialorder %v33_v9, 0.0  ;;  %v270_v57 = vld [vmem:[%s604_s2] sm:$0xff]  ;;  %289 = vmatpush.msra.mxu3 %v271_v56  ;;  %s534_s2 = smov 123   ;;  %s535_s5 = smov [#allocation5]  }
   0x9   :  { %427 = vmatmul.msk.f32.vlgmr.msra.gmra.mxu0 %vm38_vm0, %v32_v3  ;;  %v574_v15 = vsel %vm34_vm1, 0.0, %v531_v14  ;;  %v533_v14 = vmov 4   ;;  %s415_s6 = sshll.u32 %s535_s5, 4  ;;  %s417_s9 = sshll.u32 %s606_s4, 4  ;;  %s416_s6 = int_to_ptr.vmem [resolvable:$true] %s415_s6  ;;  %s418_s9 = int_to_ptr.hbm [resolvable:$true] %s417_s9 }
   0xa   :  { %290 = vmatpush.msra.mxu3 %v270_v57 }
  0x86   :  { %v59_v5 = vpop.f32.mrf.mxu0 }
  0x87   :  { %99 = vperm.xlu2 %448, %v59_v5   ;;  %163 = vrot.lane.b32.xlu0 %v59_v5, %s528_s25 }
  0x88   :  { %151 = vmatpush.msra.mxu1 %v59_v5 }
  0x8f   :  { %199 = vperm.xlu0 %447, %v59_v5   ;;  %449 = vset.pattern.permute.xlu2 %v533_v14 }
  0x97   :  { %232 = vrot.lane.b32.xlu0 %v59_v5, %s529_s26 }
  0xe1   :  { %v100_v20 = vpop.permute.xlu2 %99 }
  0xf9   :  { %v164_v6 = vpop.permute.xlu0 %163 }
  0xfa   :  { %166 = vxpose.xlu1.b32.start.end [1/1] (short) (narrow) %v164_v6, 8 }
 0x101   :  { %v200_v7 = vpop.permute.xlu0 %199 }
 0x109   :  { %v233_v8 = vpop.permute.xlu0 %232 }
 0x10a   :  { %253 = vmatpush.msra.mxu2 %v233_v8 }
 0x154   :  { %63 = vrot.lane.b32.xlu1 %v59_v5, %s530_s0 }
 0x19e   :  { %v182_v10 = vpop.trf.xlu1 }
 0x19f   :  { %v202_v11 = vperm.slane %v182_v10, 0 }
 0x1a1   :  { %v203_v12 = vadd.f32 %v202_v11, %v200_v7 }
 0x1a3   :  { %v205_v13 = vmul.f32 0.2, %v203_v12  ;;  %vm204_vm2 = vcmp.gt.f32.partialorder %v203_v12, 0.0 }
 0x1a5   :  { %v206_v16 = vsel %vm204_vm2, %v203_v12, %v205_v13 }
 0x1a6   :  { %v207_v17 = vadd.f32 %v206_v16, %v574_v15 }
 0x1a8   :  { %v208_v18 = vsel %vm108_vm3, %v207_v17, -inf }
 0x1a9   :  { %209 = vmax.xlane.f32.xlu2 %v208_v18 }
 0x1c6   :  { %v64_v19 = vpop.permute.xlu1 %63 }
 0x1c7   :  { %66 = vxpose.xlu0.b32.start.end [1/1] (short) (narrow) %v64_v19, 8 }
 0x21c   :  { %v210_v21 = vpop.xlane.xlu2 %209 }
 0x21d   :  { %v211_v22 = vsub.f32 %v207_v17, %v210_v21 }
 0x21f   :  { %v212_v23 = vmul.f32 1.442695, %v211_v22 }
 0x221   :  { %451 = vpow2.f32 %v212_v23 }
 0x227   :  { %v452_v24 = vpop.eup %451 }
 0x228   :  { %430 = vmatmul.msk.f32.vlgmr.msra.gmra.mxu2 %vm108_vm3, %v452_v24  ;;  %v214_v32 = vsel %vm108_vm3, %v452_v24, 0.0 }
 0x22e   :  { %450 = vset.pattern.permute.xlu0 %v533_v14 }
 0x26b   :  { %v82_v25 = vpop.trf.xlu0 }
 0x26c   :  { %v102_v26 = vperm.slane %v82_v25, 0 }
 0x26e   :  { %v103_v27 = vadd.f32 %v102_v26, %v100_v20 }
 0x270   :  { %v105_v28 = vmul.f32 0.2, %v103_v27  ;;  %vm104_vm4 = vcmp.gt.f32.partialorder %v103_v27, 0.0 }
 0x272   :  { %v106_v29 = vsel %vm104_vm4, %v103_v27, %v105_v28 }
 0x273   :  { %v107_v30 = vadd.f32 %v106_v29, %v574_v15 }
 0x275   :  { %v109_v31 = vsel %vm108_vm3, %v107_v30, -inf }
 0x276   :  { %110 = vmax.xlane.f32.xlu2 %v109_v31 }
 0x27e   :  { %215 = vadd.xlane.f32.xlu2 %v214_v32 }
 0x2ab   :  { %v255_v48 = vpop.f32.mrf.mxu2 }
 0x2e9   :  { %v111_v33 = vpop.xlane.xlu2 %110 }
 0x2ea   :  { %v112_v34 = vsub.f32 %v107_v30, %v111_v33 }
 0x2ec   :  { %v113_v35 = vmul.f32 1.442695, %v112_v34 }
 0x2ee   :  { %453 = vpow2.f32 %v113_v35 }
 0x2f1   :  { %v216_v36 = vpop.xlane.xlu2 %215 }
 0x2f2   :  { %455 = vrcp.f32 %v216_v36  ;;  %v228_v42 = vand.u32 2147483648, %v216_v36  ;;  %v226_v44 = vand.u32 2147483647, %v216_v36  ;;  %vm222_vm6 = vweird.f32 %v216_v36 }
 0x2f4   :  { %v454_v37 = vpop.eup %453  ;;  %v229_v46 = vor.u32 1.1754944e-38, %v228_v42  ;;  %vm227_vm8 = vcmp.eq.f32.partialorder %v226_v44, 8.507059e+37 }
 0x2f5   :  { %428 = vmatmul.msk.f32.vlgmr.msra.gmra.mxu1 %vm108_vm3, %v454_v37  ;;  %v115_v38 = vsel %vm108_vm3, %v454_v37, 0.0 }
 0x2f6   :  { %116 = vadd.xlane.f32.xlu2 %v115_v38 }
 0x2f8   :  { %v456_v39 = vpop.eup %455 }
 0x2f9   :  { %v218_v40 = vmul.f32 %v456_v39, %v216_v36  ;;  %vm223_vm5 = vweird.f32 %v456_v39 }
 0x2fa   :  { %vm224_vm7 = vmor %vm222_vm6, %vm223_vm5 }
 0x2fb   :  { %v219_v41 = vsub.f32 1.0, %v218_v40 }
 0x2fd   :  { %v220_v43 = vmul.f32 %v456_v39, %v219_v41 }
 0x2ff   :  { %v221_v45 = vadd.f32 %v456_v39, %v220_v43 }
 0x301   :  { %v225_v47 = vsel %vm224_vm7, %v456_v39, %v221_v45 }
 0x302   :  { %v230_v49 = vsel %vm227_vm8, %v229_v46, %v225_v47 }
 0x303   :  { %v258_v50 = vmul.f32 %v255_v48, %v230_v49 }
 0x305   :  { %v260_v51 = vmin.f32 %v258_v50, 0.0  ;;  %vm259_vm9 = vcmp.gt.f32.partialorder %v258_v50, 0.0 }
 0x307   :  { %v261_v52 = vmul.f32 1.442695, %v260_v51 }
 0x309   :  { %457 = vpow2.f32 %v261_v52 }
 0x30f   :  { %v458_v53 = vpop.eup %457 }
 0x310   :  { %v431_v54 = vadd.f32 -1.0, %v458_v53 }
 0x312   :  { %v264_v55 = vsel %vm259_vm9, %v258_v50, %v431_v54 }
 0x313   :  { %266 = vrot.lane.b32.xlu0 %v264_v55, %s532_s1 }
 0x369   :  { %v117_v58 = vpop.xlane.xlu2 %116 }
 0x36a   :  { %459 = vrcp.f32 %v117_v58  ;;  %v129_v62 = vand.u32 2147483648, %v117_v58  ;;  %v127_v0 = vand.u32 2147483647, %v117_v58  ;;  %vm123_vm11 = vweird.f32 %v117_v58 }
 0x36c   :  { %v130_v2 = vor.u32 1.1754944e-38, %v129_v62  ;;  %vm128_vm13 = vcmp.eq.f32.partialorder %v127_v0, 8.507059e+37 }
 0x370   :  { %v460_v59 = vpop.eup %459 }
 0x371   :  { %v119_v60 = vmul.f32 %v460_v59, %v117_v58  ;;  %vm124_vm10 = vweird.f32 %v460_v59 }
 0x372   :  { %vm125_vm12 = vmor %vm123_vm11, %vm124_vm10  ;;  %v153_v5 = vpop.f32.mrf.mxu1 }
 0x373   :  { %v120_v61 = vsub.f32 1.0, %v119_v60 }
 0x375   :  { %v121_v63 = vmul.f32 %v460_v59, %v120_v61 }
 0x377   :  { %v122_v1 = vadd.f32 %v460_v59, %v121_v63 }
 0x379   :  { %v126_v3 = vsel %vm125_vm12, %v460_v59, %v122_v1 }
 0x37a   :  { %v131_v4 = vsel %vm128_vm13, %v130_v2, %v126_v3 }
 0x37b   :  { %v156_v6 = vmul.f32 %v153_v5, %v131_v4 }
 0x37d   :  { %v158_v7 = vmin.f32 %v156_v6, 0.0  ;;  %vm157_vm14 = vcmp.gt.f32.partialorder %v156_v6, 0.0 }
 0x37f   :  { %v159_v8 = vmul.f32 1.442695, %v158_v7 }
 0x381   :  { %461 = vpow2.f32 %v159_v8 }
 0x385   :  { %v267_v11 = vpop.permute.xlu0 %266 }
 0x387   :  { %v462_v9 = vpop.eup %461 }
 0x388   :  { %v429_v10 = vadd.f32 -1.0, %v462_v9 }
 0x38a   :  { %v162_v12 = vsel %vm157_vm14, %v156_v6, %v429_v10 }
 0x38b   :  { %v269_v13 = vsel %vm108_vm3, %v162_v12, %v267_v11 }
 0x38c   :  { %432 = vmatmul.msk.f32.vlgmr.msra.gmra.mxu3 %vm38_vm0, %v269_v13 }
 0x40f   :  { %v292_v16 = vpop.f32.mrf.mxu3 }
 0x410   :  { %296 = vrot.lane.b32.xlu2 %v292_v16, %s534_s2  ;;  %383 = vmatpush.msrb.mxu1 %v292_v16 }
 0x418   :  { %332 = vperm.xlu2 %449, %v292_v16  }
 0x46a   :  { %v297_v17 = vpop.permute.xlu2 %296 }
 0x46b   :  { %299 = vxpose.xlu1.b32.start.end [1/1] (short) (narrow) %v297_v17, 8 }
 0x472   :  { %v333_v20 = vpop.permute.xlu2 %332 }
 0x50f   :  { %v315_v18 = vpop.trf.xlu1 }
 0x510   :  { %v335_v19 = vperm.slane %v315_v18, 0 }
 0x512   :  { %v336_v21 = vadd.f32 %v335_v19, %v333_v20 }
 0x514   :  { %v338_v22 = vmul.f32 0.2, %v336_v21  ;;  %vm337_vm15 = vcmp.gt.f32.partialorder %v336_v21, 0.0 }
 0x516   :  { %v339_v23 = vsel %vm337_vm15, %v336_v21, %v338_v22 }
 0x517   :  { %v340_v24 = vadd.f32 %v339_v23, %v574_v15 }
 0x519   :  { %v341_v25 = vsel %vm108_vm3, %v340_v24, -inf }
 0x51a   :  { %342 = vmax.xlane.f32.xlu2 %v341_v25 }
 0x58d   :  { %v343_v26 = vpop.xlane.xlu2 %342 }
 0x58e   :  { %v344_v27 = vsub.f32 %v340_v24, %v343_v26 }
 0x590   :  { %v345_v28 = vmul.f32 1.442695, %v344_v27 }
 0x592   :  { %463 = vpow2.f32 %v345_v28 }
 0x598   :  { %v464_v29 = vpop.eup %463 }
 0x599   :  { %433 = vmatmul.msk.f32.vlgmr.msrb.gmra.mxu1 %vm108_vm3, %v464_v29  ;;  %v347_v30 = vsel %vm108_vm3, %v464_v29, 0.0  ;;  %vm395_vm3 = vcmask 31744  }
 0x59a   :  { %348 = vadd.xlane.f32.xlu2 %v347_v30 }
 0x60d   :  { %v349_v31 = vpop.xlane.xlu2 %348 }
 0x60e   :  { %465 = vrcp.f32 %v349_v31  ;;  %v361_v35 = vand.u32 2147483648, %v349_v31  ;;  %v359_v36 = vand.u32 2147483647, %v349_v31  ;;  %vm355_vm1 = vweird.f32 %v349_v31 }
 0x610   :  { %v362_v38 = vor.u32 1.1754944e-38, %v361_v35  ;;  %vm360_vm4 = vcmp.eq.f32.partialorder %v359_v36, 8.507059e+37 }
 0x614   :  { %v466_v32 = vpop.eup %465 }
 0x615   :  { %v351_v33 = vmul.f32 %v466_v32, %v349_v31  ;;  %vm356_vm0 = vweird.f32 %v466_v32 }
 0x616   :  { %vm357_vm2 = vmor %vm355_vm1, %vm356_vm0  ;;  %v385_v41 = vpop.f32.mrf.mxu1 }
 0x617   :  { %v352_v34 = vsub.f32 1.0, %v351_v33 }
 0x619   :  { %v353_v15 = vmul.f32 %v466_v32, %v352_v34 }
 0x61b   :  { %v354_v37 = vadd.f32 %v466_v32, %v353_v15 }
 0x61d   :  { %v358_v39 = vsel %vm357_vm2, %v466_v32, %v354_v37 }
 0x61e   :  { %v363_v40 = vsel %vm360_vm4, %v362_v38, %v358_v39 }
 0x61f   :  { %v388_v42 = vmul.f32 %v385_v41, %v363_v40 }
 0x621   :  { %v390_v43 = vmin.f32 %v388_v42, 0.0  ;;  %vm389_vm5 = vcmp.gt.f32.partialorder %v388_v42, 0.0 }
 0x623   :  { %v391_v44 = vmul.f32 1.442695, %v390_v43 }
 0x625   :  { %467 = vpow2.f32 %v391_v44 }
 0x62b   :  { %v468_v45 = vpop.eup %467 }
 0x62c   :  { %v434_v46 = vadd.f32 -1.0, %v468_v45 }
 0x62e   :  { %v394_v47 = vsel %vm389_vm5, %v388_v42, %v434_v46 }
 0x62f   :  { %v396_v48 = vsel %vm395_vm3, %v394_v47, -inf }
 0x630   :  { %397 = vmax.xlane.f32.xlu1 %v396_v48 }
 0x6a3   :  { %v398_v49 = vpop.xlane.xlu1 %397 }
 0x6a4   :  { %v399_v50 = vsub.f32 %v394_v47, %v398_v49 }
 0x6a6   :  { %v400_v51 = vmul.f32 1.442695, %v399_v50 }
 0x6a8   :  { %469 = vpow2.f32 %v400_v51 }
 0x6ae   :  { %v470_v52 = vpop.eup %469 }
 0x6af   :  { %v402_v53 = vsel %vm395_vm3, %v470_v52, 0.0 }
 0x6b0   :  { %403 = vadd.xlane.f32.xlu2 %v402_v53 }
 0x723   :  { %v404_v54 = vpop.xlane.xlu2 %403 }
 0x724   :  { %471 = vlog2.f32 %v404_v54 }
 0x72a   :  { %v472_v55 = vpop.eup %471 }
 0x72b   :  { %v406_v56 = vmul.f32 0.6931472, %v472_v55 }
 0x72d   :  { %v407_v57 = vsub.f32 %v399_v50, %v406_v56 }
 0x72f   :  { %v408_v58 = vsel %vm395_vm3, %v407_v57, 0.0 }
 0x730   :  { %409 = vst [vmem:[#allocation5] sm:$0xff] %v408_v58 }
 0x731   :  { %420 = dma.vmem_to_hbm [thread:$0]  %s416_s6, 128, %s418_s9, [#allocation4]  }
 0x732   :  { %523 = dma.done.wait [#allocation4], 128  }
 0x733   :  { %524 = vsyncadd [#allocation4], 4294967168 }
 0x734   :  { %425 = vsyncpa [#allocation3], 1 }
 0x735   :  { %426 = vsyncpa [#allocation4], 1 }

</bundles_post_ra>
